<compile_context>
chip_gen: v6e
topology: v6e:2x2x1
jax: 0.10.0
libtpu: 0.0.40
codegen_flags: <defaults>
</compile_context>

<pallas_src>
import jax
import jax.numpy as jnp
from jax.experimental import pallas as pl
from jax.experimental.pallas import tpu as pltpu

HIDDEN = 128      # hidden width of both MLP layers
TB_MAX = 512      # max batch rows per grid step (multiple of 16)
NEG_BIG = -1e30   # f32 bias padding: exp(NEG_BIG - rowmax) == 0 exactly


def _round_up(x, m):
    return ((x + m - 1) // m) * m


def _choose_tb(batch):
    """Adaptive batch tile.

    Tiny rollout batches get a tiny tile (no 97% padding waste); large batches
    get TB_MAX-row tiles to amortize per-grid-step overhead.  When the padded
    batch splits cleanly into two multiple-of-16 tiles, prefer 2 grid steps so
    v7x's two TensorCores both get work (harmless on v5e/v6e).
    """
    b16 = _round_up(max(batch, 1), 16)
    if b16 <= TB_MAX:
        if b16 >= 64 and b16 % 32 == 0:
            return b16 // 2          # 2 even grid steps
        return b16                    # single step
    return TB_MAX


def pg_reinforce_kernel(x_ref, w1_ref, b1_ref, w2_ref, b2_ref, w3_ref, b3_ref,
                        out_ref):
    """Fused MLP + softmax on one (TB, n_obs_pad) batch tile.

    bf16 operands feed the MXU; accumulation, bias adds and softmax are f32.
    Weights/biases are grid-resident; only x/out tiles stream per step.
    The action head is padded to out_ref.shape[1] lanes with NEG_BIG bias so
    padded lanes contribute exactly 0 to the softmax.
    """
    x = x_ref[...]                                   # (TB, n_obs_pad) bf16

    # layer1 + ReLU
    h1 = jnp.dot(x, w1_ref[...], preferred_element_type=jnp.float32) + b1_ref[...]
    h1 = jnp.maximum(h1, 0.0)

    # layer2 + ReLU
    h2 = jnp.dot(h1.astype(jnp.bfloat16), w2_ref[...],
                 preferred_element_type=jnp.float32) + b2_ref[...]
    h2 = jnp.maximum(h2, 0.0)

    # prob_stream (logits head, padded to N_PAD lanes; pad bias = NEG_BIG in f32)
    logits = jnp.dot(h2.astype(jnp.bfloat16), w3_ref[...],
                     preferred_element_type=jnp.float32) + b3_ref[...]

    # numerically stable softmax along the action axis; padded lanes contribute 0.
    m = jnp.max(logits, axis=1, keepdims=True)
    e = jnp.exp(logits - m)
    denom = jnp.sum(e, axis=1, keepdims=True)
    inv = pl.reciprocal(denom, approx=False)   # exact; (TB,1) only -> essentially free
    out_ref[...] = (e * inv).astype(out_ref.dtype)


def pg_reinforce_forward(x, kernel_params, n_actions):
    """x: (B, n_obs) f32/bf16. kernel_params: output of prepare_kernel_params.

    Returns f32 probabilities of shape (B, n_actions).
    """
    w1, b1, w2, b2, w3p, b3p = kernel_params
    B, n_obs = x.shape
    n_obs_pad = w1.shape[0]
    n_pad = w3p.shape[1]

    tb = _choose_tb(B)
    B_pad = _round_up(B, tb)

    x = x.astype(jnp.bfloat16)
    x = jnp.pad(x, ((0, B_pad - B), (0, n_obs_pad - n_obs)))

    grid = (B_pad // tb,)

    out = pl.pallas_call(
        pg_reinforce_kernel,
        # bf16 output halves the dominant writeback stream; wrapper upcasts after slicing.
        out_shape=jax.ShapeDtypeStruct((B_pad, n_pad), jnp.bfloat16),
        grid_spec=pltpu.PrefetchScalarGridSpec(
            num_scalar_prefetch=0,
            grid=grid,
            in_specs=[
                pl.BlockSpec((tb, n_obs_pad), lambda i: (i, 0)),      # x tile (streamed)
                pl.BlockSpec((n_obs_pad, HIDDEN), lambda i: (0, 0)),  # w1 (resident)
                pl.BlockSpec((1, HIDDEN), lambda i: (0, 0)),          # b1 (f32)
                pl.BlockSpec((HIDDEN, HIDDEN), lambda i: (0, 0)),     # w2 (resident)
                pl.BlockSpec((1, HIDDEN), lambda i: (0, 0)),          # b2 (f32)
                pl.BlockSpec((HIDDEN, n_pad), lambda i: (0, 0)),      # w3 (narrow head)
                pl.BlockSpec((1, n_pad), lambda i: (0, 0)),           # b3 (f32, NEG_BIG pad)
            ],
            out_specs=pl.BlockSpec((tb, n_pad), lambda i: (i, 0)),
        ),
        compiler_params=pltpu.CompilerParams(
            dimension_semantics=("parallel",)),
    )(x, w1, b1, w2, b2, w3p, b3p)

    return out[:B, :n_actions].astype(jnp.float32)


def init_params(key, n_observations, n_actions):
    """f32 reference params; mimics torch.nn.Linear default init (U[-1/sqrt(fan_in), +]).
    Weights stored as (in_features, out_features) so y = x @ W + b."""
    def linear(key, fan_in, fan_out):
        kw, kb = jax.random.split(key)
        bound = 1.0 / jnp.sqrt(fan_in)
        w = jax.random.uniform(kw, (fan_in, fan_out), jnp.float32, -bound, bound)
        b = jax.random.uniform(kb, (1, fan_out), jnp.float32, -bound, bound)
        return w, b

    k1, k2, k3 = jax.random.split(key, 3)
    w1, b1 = linear(k1, n_observations, HIDDEN)
    w2, b2 = linear(k2, HIDDEN, HIDDEN)
    w3, b3 = linear(k3, HIDDEN, n_actions)
    return (w1, b1, w2, b2, w3, b3)


def prepare_kernel_params(params, n_observations, n_actions):
    """Cast weights to bf16 (MXU operands); pad n_obs to a multiple of 8 with zero
    rows and the action head to N_PAD = round_up(n_actions, 8) columns.

    Padded w1 rows / w3 columns are 0; padded b3 columns are NEG_BIG.  b3p MUST
    stay f32 so that exp(NEG_BIG - rowmax) == 0 exactly — do not cast it to a
    narrower dtype.
    """
    w1, b1, w2, b2, w3, b3 = params
    n_obs_pad = max(8, _round_up(n_observations, 8))
    n_pad = max(8, _round_up(n_actions, 8))

    w1p = jnp.zeros((n_obs_pad, HIDDEN), jnp.float32).at[:n_observations, :].set(w1)
    w3p = jnp.zeros((HIDDEN, n_pad), jnp.float32).at[:, :n_actions].set(w3)
    b3p = jnp.full((1, n_pad), NEG_BIG, jnp.float32).at[:, :n_actions].set(b3)

    return (w1p.astype(jnp.bfloat16), b1,
            w2.astype(jnp.bfloat16), b2,
            w3p.astype(jnp.bfloat16), b3p)


def reference_forward(x, params):
    """Pure-f32 reference (matches the PyTorch module's math)."""
    w1, b1, w2, b2, w3, b3 = params
    h1 = jnp.maximum(x @ w1 + b1, 0.0)
    h2 = jnp.maximum(h1 @ w2 + b2, 0.0)
    logits = h2 @ w3 + b3
    return jax.nn.softmax(logits, axis=1)


if __name__ == "__main__":
    # CartPole-v1: 4 observations, 2 actions.
    n_observations, n_actions = 4, 2

    key = jax.random.PRNGKey(0)
    kx, kp = jax.random.split(key)
    params = init_params(kp, n_observations, n_actions)
    kparams = prepare_kernel_params(params, n_observations, n_actions)

    # Case 1: batch of 512 -> adaptive TB=256, 2 grid steps (pipelined; v7x shards
    # the two steps across its 2 TensorCores).
    x_big = jax.random.normal(kx, (512, n_observations), jnp.float32)
    out_big = jax.block_until_ready(pg_reinforce_forward(x_big, kparams, n_actions))
    ref_big = reference_forward(x_big, params)

    assert out_big.shape == (512, n_actions)
    # bf16 output quantization (~2^-9 per prob) + bf16 MXU operands -> loosened tolerances.
    assert jnp.allclose(jnp.sum(out_big, axis=1), 1.0, atol=1e-2)
    assert jnp.allclose(out_big, ref_big, atol=2e-2)

    # Case 2: tiny rollout-style batch -> adaptive TB=16, single grid step (no
    # 256-row padding waste).
    x_small = jax.random.normal(jax.random.fold_in(kx, 1),
                                (8, n_observations), jnp.float32)
    out_small = jax.block_until_ready(
        pg_reinforce_forward(x_small, kparams, n_actions))
    ref_small = reference_forward(x_small, params)

    assert out_small.shape == (8, n_actions)
    assert jnp.allclose(jnp.sum(out_small, axis=1), 1.0, atol=1e-2)
    assert jnp.allclose(out_small, ref_small, atol=2e-2)

    print("KERNEL_OK")
</pallas_src>

<mosaic_0001>
module attributes {stable_mosaic.version = 11 : i64} {
  func.func @pg_reinforce_kernel(%arg0: i32, %arg1: memref<256x8xbf16, #tpu.memory_space<vmem>>, %arg2: memref<8x128xbf16, #tpu.memory_space<vmem>>, %arg3: memref<1x128xf32, #tpu.memory_space<vmem>>, %arg4: memref<128x128xbf16, #tpu.memory_space<vmem>>, %arg5: memref<1x128xf32, #tpu.memory_space<vmem>>, %arg6: memref<128x8xbf16, #tpu.memory_space<vmem>>, %arg7: memref<1x8xf32, #tpu.memory_space<vmem>>, %arg8: memref<256x8xbf16, #tpu.memory_space<vmem>>) attributes {dimension_semantics = [#tpu.dimension_semantics<parallel>], iteration_bounds = array<i64: 2>, scalar_prefetch = 0 : i64, scratch_operands = 0 : i64, tpu.core_type = #tpu.core_type<tc>, window_params = [{transform_indices = @transform_0, window_bounds = array<i64: 256, 8>}, {pipeline_mode = #tpu.pipeline_mode<synchronous>, transform_indices = @transform_1, window_bounds = array<i64: 8, 128>}, {pipeline_mode = #tpu.pipeline_mode<synchronous>, transform_indices = @transform_2, window_bounds = array<i64: 1, 128>}, {pipeline_mode = #tpu.pipeline_mode<synchronous>, transform_indices = @transform_3, window_bounds = array<i64: 128, 128>}, {pipeline_mode = #tpu.pipeline_mode<synchronous>, transform_indices = @transform_4, window_bounds = array<i64: 1, 128>}, {pipeline_mode = #tpu.pipeline_mode<synchronous>, transform_indices = @transform_5, window_bounds = array<i64: 128, 8>}, {pipeline_mode = #tpu.pipeline_mode<synchronous>, transform_indices = @transform_6, window_bounds = array<i64: 1, 8>}, {transform_indices = @transform_7, window_bounds = array<i64: 256, 8>}]} {
    %c0 = arith.constant 0 : index
    %c0_0 = arith.constant 0 : index
    %0 = vector.load %arg1[%c0, %c0_0] : memref<256x8xbf16, #tpu.memory_space<vmem>>, vector<256x8xbf16>
    %c0_1 = arith.constant 0 : index
    %c0_2 = arith.constant 0 : index
    %1 = vector.load %arg2[%c0_1, %c0_2] : memref<8x128xbf16, #tpu.memory_space<vmem>>, vector<8x128xbf16>
    %cst = arith.constant dense<0.000000e+00> : vector<256x128xf32>
    %2 = tpu.matmul %0, %1, %cst {dimension_numbers = #tpu.dot_dimension_numbers<[1], [0], [0], [1], [0, 0, 1, 1], [], []>} : vector<256x8xbf16>, vector<8x128xbf16>, vector<256x128xf32> -> vector<256x128xf32>
    %c0_3 = arith.constant 0 : index
    %c0_4 = arith.constant 0 : index
    %3 = vector.load %arg3[%c0_3, %c0_4] : memref<1x128xf32, #tpu.memory_space<vmem>>, vector<1x128xf32>
    %4 = vector.broadcast %3 : vector<1x128xf32> to vector<256x128xf32>
    %5 = arith.addf %2, %4 : vector<256x128xf32>
    %cst_5 = arith.constant 0.000000e+00 : f32
    %6 = vector.broadcast %cst_5 : f32 to vector<256x128xf32>
    %7 = arith.maximumf %5, %6 : vector<256x128xf32>
    %8 = arith.truncf %7 : vector<256x128xf32> to vector<256x128xbf16>
    %c0_6 = arith.constant 0 : index
    %c0_7 = arith.constant 0 : index
    %9 = vector.load %arg4[%c0_6, %c0_7] : memref<128x128xbf16, #tpu.memory_space<vmem>>, vector<128x128xbf16>
    %cst_8 = arith.constant dense<0.000000e+00> : vector<256x128xf32>
    %10 = tpu.matmul %8, %9, %cst_8 {dimension_numbers = #tpu.dot_dimension_numbers<[1], [0], [0], [1], [0, 0, 1, 1], [], []>} : vector<256x128xbf16>, vector<128x128xbf16>, vector<256x128xf32> -> vector<256x128xf32>
    %c0_9 = arith.constant 0 : index
    %c0_10 = arith.constant 0 : index
    %11 = vector.load %arg5[%c0_9, %c0_10] : memref<1x128xf32, #tpu.memory_space<vmem>>, vector<1x128xf32>
    %12 = vector.broadcast %11 : vector<1x128xf32> to vector<256x128xf32>
    %13 = arith.addf %10, %12 : vector<256x128xf32>
    %cst_11 = arith.constant 0.000000e+00 : f32
    %14 = vector.broadcast %cst_11 : f32 to vector<256x128xf32>
    %15 = arith.maximumf %13, %14 : vector<256x128xf32>
    %16 = arith.truncf %15 : vector<256x128xf32> to vector<256x128xbf16>
    %c0_12 = arith.constant 0 : index
    %c0_13 = arith.constant 0 : index
    %17 = vector.load %arg6[%c0_12, %c0_13] : memref<128x8xbf16, #tpu.memory_space<vmem>>, vector<128x8xbf16>
    %cst_14 = arith.constant dense<0.000000e+00> : vector<256x8xf32>
    %18 = tpu.matmul %16, %17, %cst_14 {dimension_numbers = #tpu.dot_dimension_numbers<[1], [0], [0], [1], [0, 0, 1, 1], [], []>} : vector<256x128xbf16>, vector<128x8xbf16>, vector<256x8xf32> -> vector<256x8xf32>
    %c0_15 = arith.constant 0 : index
    %c0_16 = arith.constant 0 : index
    %19 = vector.load %arg7[%c0_15, %c0_16] : memref<1x8xf32, #tpu.memory_space<vmem>>, vector<1x8xf32>
    %20 = vector.broadcast %19 : vector<1x8xf32> to vector<256x8xf32>
    %21 = arith.addf %18, %20 : vector<256x8xf32>
    %cst_17 = arith.constant dense<0xFF800000> : vector<256xf32>
    %22 = vector.multi_reduction <maximumf>, %21, %cst_17 [1] : vector<256x8xf32> to vector<256xf32>
    %23 = vector.shape_cast %22 : vector<256xf32> to vector<256x1xf32>
    %24 = vector.broadcast %23 : vector<256x1xf32> to vector<256x8xf32>
    %25 = arith.subf %21, %24 : vector<256x8xf32>
    %26 = math.exp %25 : vector<256x8xf32>
    %cst_18 = arith.constant dense<0.000000e+00> : vector<256xf32>
    %27 = vector.multi_reduction <add>, %26, %cst_18 [1] : vector<256x8xf32> to vector<256xf32>
    %28 = vector.shape_cast %27 : vector<256xf32> to vector<256x1xf32>
    %29 = tpu.reciprocal %28 : vector<256x1xf32> -> vector<256x1xf32>
    %30 = vector.broadcast %29 : vector<256x1xf32> to vector<256x8xf32>
    %31 = arith.mulf %26, %30 : vector<256x8xf32>
    %32 = arith.truncf %31 : vector<256x8xf32> to vector<256x8xbf16>
    %c0_19 = arith.constant 0 : index
    %c0_20 = arith.constant 0 : index
    %33 = vector.load %arg8[%c0_19, %c0_20] : memref<256x8xbf16, #tpu.memory_space<vmem>>, vector<256x8xbf16>
    tpu.vector_store %arg8[%c0_19, %c0_20], %32 {strides = array<i32>} : memref<256x8xbf16, #tpu.memory_space<vmem>>, vector<256x8xbf16>,
    return
  }
  func.func @transform_0(%arg0: i32) -> (i32, i32) {
    %c0_i32 = arith.constant 0 : i32
    %c0_i32_0 = arith.constant 0 : i32
    return %arg0, %c0_i32 : i32, i32
  }
  func.func @transform_1(%arg0: i32) -> (i32, i32) {
    %c0_i32 = arith.constant 0 : i32
    %c0_i32_0 = arith.constant 0 : i32
    %c0_i32_1 = arith.constant 0 : i32
    return %c0_i32, %c0_i32_0 : i32, i32
  }
  func.func @transform_2(%arg0: i32) -> (i32, i32) {
    %c0_i32 = arith.constant 0 : i32
    %c0_i32_0 = arith.constant 0 : i32
    %c0_i32_1 = arith.constant 0 : i32
    return %c0_i32, %c0_i32_0 : i32, i32
  }
  func.func @transform_3(%arg0: i32) -> (i32, i32) {
    %c0_i32 = arith.constant 0 : i32
    %c0_i32_0 = arith.constant 0 : i32
    %c0_i32_1 = arith.constant 0 : i32
    return %c0_i32, %c0_i32_0 : i32, i32
  }
  func.func @transform_4(%arg0: i32) -> (i32, i32) {
    %c0_i32 = arith.constant 0 : i32
    %c0_i32_0 = arith.constant 0 : i32
    %c0_i32_1 = arith.constant 0 : i32
    return %c0_i32, %c0_i32_0 : i32, i32
  }
  func.func @transform_5(%arg0: i32) -> (i32, i32) {
    %c0_i32 = arith.constant 0 : i32
    %c0_i32_0 = arith.constant 0 : i32
    %c0_i32_1 = arith.constant 0 : i32
    return %c0_i32, %c0_i32_0 : i32, i32
  }
  func.func @transform_6(%arg0: i32) -> (i32, i32) {
    %c0_i32 = arith.constant 0 : i32
    %c0_i32_0 = arith.constant 0 : i32
    %c0_i32_1 = arith.constant 0 : i32
    return %c0_i32, %c0_i32_0 : i32, i32
  }
  func.func @transform_7(%arg0: i32) -> (i32, i32) {
    %c0_i32 = arith.constant 0 : i32
    %c0_i32_0 = arith.constant 0 : i32
    return %arg0, %c0_i32 : i32, i32
  }
}

</mosaic_0001>

<bundles_post_ra>
// kernel: tpu_custom_call.1
= control target key start
LH: loop header
LB: loop body
LE: loop exit
PB: predicated region body
PF: predicated region fallthrough
CT: control target
= control target key end

     0   :  { %s2287_s24 = smov 0   ;;  %s2902_s0 = inlined_call_operand.vmem [shape: bf16[512,8], index: 0, kind: input, shape index: {}]   ;;  %s2903_s1 = inlined_call_operand.vmem [shape: bf16[8,128], index: 1, kind: input, shape index: {}]   ;;  %s2904_s2 = inlined_call_operand.vmem [shape: f32[1,128], index: 2, kind: input, shape index: {}]   ;;  %s2905_s3 = inlined_call_operand.vmem [shape: bf16[128,128], index: 3, kind: input, shape index: {}]   ;;  %s2906_s4 = inlined_call_operand.vmem [shape: f32[1,128], index: 4, kind: input, shape index: {}]   ;;  %s2907_s5 = inlined_call_operand.vmem [shape: bf16[128,8], index: 5, kind: input, shape index: {}]   ;;  %s2908_s6 = inlined_call_operand.vmem [shape: f32[1,8], index: 6, kind: input, shape index: {}]   ;;  %s2909_s7 = inlined_call_operand.vmem [shape: bf16[512,8], index: 7, kind: output, shape index: {}]  }
   0x1 LB: > { %s1746_s25 = sadd.s32 4294967295, %s2245_s24   ;;  %p1750_p0 = scmp.ge.s32.totalorder %s2245_s24, 1  ;;  %s2245_s24 = sphi %s2287_s24, %s17_s24  }
   0x2   : > { %p238_p1 = scmp.lt.s32.totalorder %s2245_s24, 3 }
   0x4   : > { %p239_p2 = pnand %p1750_p0, %p238_p1 }
   0x5   : > { %s1751_s28 = sshll.u32 (!%p239_p2), %s1746_s25, 5 }
   0x6   : > { %242 = sbr.rel (%p239_p2) target bundleno = 1004 (0x3ec), region = 48  ;;  %p271_p3 = scmp.lt.s32.totalorder (!%p239_p2), %s1751_s28, 63 }
   0xb   : > { %v315_v0 = vld [vmem:[%s2903_s1] sm:$0xf]  ;;  %vm452_vm0 = vcmask 1043456   ;;  %v2095_v1 = vld [vmem:[%s2905_s3 + $0x38] sm:$0xff]   ;;  %s2911_s28 = smov (!%p271_p3, %s1751_s28), 63  ;;  %vm403_vm1 = vcmask 64512  }
   0xc   : > { %2069 = vmatprep.subr.msk.bf16.mxu0 %vm452_vm0, %v315_v0  ;;  %v454_v2 = vsel %vm452_vm0, %v315_v0, 0  ;;  %2070 = vmatprep.subr.msk.bf16.mxu1 %vm452_vm0, %v315_v0  ;;  %s1752_s8 = sshll.u32 %s2911_s28, 2  ;;  %v2096_v9 = vld [vmem:[%s2905_s3 + $0x30] sm:$0xff]   ;;  %v2097_v12 = vld [vmem:[%s2905_s3 + $0x28] sm:$0xff]   ;;  %v2098_v17 = vld [vmem:[%s2905_s3 + $0x20] sm:$0xff]   ;;  %vm1657_vm2 = vcmask 60416  }
   0xd   : > { %1938 = vmatpush3.bf16.msra.mxu0 %v454_v2  ;;  %2068 = vmatpush3.bf16.msra.mxu1 %v454_v2  ;;  %s2309_s11 = scalar_lea.vmem %s2902_s0, %s1752_s8  ;;  %v2099_v18 = vld [vmem:[%s2905_s3 + $0x18] sm:$0xff]   ;;  %v2100_v23 = vld [vmem:[%s2905_s3 + $0x10] sm:$0xff]   ;;  %v2101_v24 = vld [vmem:[%s2905_s3 + $0x8] sm:$0xff]   ;;  %s2802_s10 = scalar_lea.vmem %s2909_s7, %s1752_s8 }
   0xe   : > { %1971 = vmatprep.subr.bf16.mxu1 %v2095_v1  ;;  %v2079_v3 = vld [vmem:[%s2309_s11] sm:$0xff]   ;;  %v2080_v4 = vld [vmem:[%s2309_s11 + $0x8] sm:$0xff]   ;;  %v2081_v5 = vld [vmem:[%s2309_s11 + $0x10] sm:$0xff]  }
   0xf   : > { %1939 = vmatprep.mubr.msk.bf16.mxu0 %vm403_vm1, %v2079_v3  ;;  %v2082_v6 = vld [vmem:[%s2309_s11 + $0x18] sm:$0xff]   ;;  %v2083_v7 = vld [vmem:[%s2309_s11 + $0x20] sm:$0xff]   ;;  %v2088_v10 = vld [vmem:[%s2309_s11 + $0x48] sm:$0xff]  }
  0x10   : > { %1940 = vmatmul.mubr.msk.bf16.vlgmr.msra.gmra.mxu0 %vm403_vm1, %v2080_v4  ;;  %v2087_v8 = vld [vmem:[%s2309_s11 + $0x40] sm:$0xff]   ;;  %v2089_v11 = vld [vmem:[%s2309_s11 + $0x50] sm:$0xff]   ;;  %v2084_v13 = vld [vmem:[%s2309_s11 + $0x28] sm:$0xff]  }
  0x11   : > { %1943 = vmatprep.mubr.msk.bf16.mxu0 %vm403_vm1, %v2081_v5  ;;  %1955 = vmatprep.mubr.msk.bf16.mxu1 %vm403_vm1, %v2087_v8  ;;  %v2085_v14 = vld [vmem:[%s2309_s11 + $0x30] sm:$0xff]   ;;  %v2090_v15 = vld [vmem:[%s2309_s11 + $0x58] sm:$0xff]   ;;  %v2091_v16 = vld [vmem:[%s2309_s11 + $0x60] sm:$0xff]  }
  0x12   : > { %1956 = vmatmul.mubr.msk.bf16.vlgmr.msra.gmra.mxu1 %vm403_vm1, %v2088_v10  ;;  %v2086_v19 = vld [vmem:[%s2309_s11 + $0x38] sm:$0xff]   ;;  %v2092_v20 = vld [vmem:[%s2309_s11 + $0x68] sm:$0xff]   ;;  %v2093_v21 = vld [vmem:[%s2309_s11 + $0x70] sm:$0xff]  }
  0x13   : > { %1959 = vmatprep.mubr.msk.bf16.mxu1 %vm403_vm1, %v2089_v11  ;;  %1972 = vmatpush3.bf16.msra.mxu1 %v2095_v1  ;;  %v2094_v22 = vld [vmem:[%s2309_s11 + $0x78] sm:$0xff]   ;;  %v2102_v25 = vld [vmem:[%s2905_s3] sm:$0xff]   ;;  %v2104_v27 = vld [vmem:[%s2907_s5 + $0x30] sm:$0xff]  }
  0x14   : > { %1973 = vmatprep.subr.bf16.mxu1 %v2096_v9  ;;  %v2103_v26 = vld [vmem:[%s2907_s5 + $0x38] sm:$0xff]   ;;  %v2105_v28 = vld [vmem:[%s2907_s5 + $0x28] sm:$0xff]   ;;  %v2106_v29 = vld [vmem:[%s2907_s5 + $0x20] sm:$0xff]  }
  0x15   : > { %2019 = vmatprep.subr.bf16.mxu0 %v2103_v26  ;;  %v2107_v30 = vld [vmem:[%s2907_s5 + $0x18] sm:$0xff]   ;;  %v2382_v33 = vld [vmem:[%s2904_s2] ss:$0 sm:$0xff] }
  0x16   : > { %2020 = vmatpush3.bf16.msra.mxu0 %v2103_v26 }
  0x17   : > { %1974 = vmatpush3.bf16.msra.mxu1 %v2096_v9  ;;  %2021 = vmatprep.subr.bf16.mxu0 %v2104_v27 }
  0x18   : > { %1944 = vmatmul.mubr.msk.bf16.gmra.mxu0 %vm403_vm1, %v2082_v6  ;;  %1975 = vmatprep.subr.bf16.mxu1 %v2097_v12 }
  0x19   : > { %1947 = vmatprep.mubr.msk.bf16.mxu0 %vm403_vm1, %v2083_v7 }
  0x1a   : > { %1960 = vmatmul.mubr.msk.bf16.gmra.mxu1 %vm403_vm1, %v2090_v15  ;;  %2022 = vmatpush3.bf16.msra.mxu0 %v2104_v27 }
  0x1b   : > { %1963 = vmatprep.mubr.msk.bf16.mxu1 %vm403_vm1, %v2091_v16  ;;  %1976 = vmatpush3.bf16.msra.mxu1 %v2097_v12 }
  0x1c   : > { %1977 = vmatprep.subr.bf16.mxu1 %v2098_v17  ;;  %2023 = vmatprep.subr.bf16.mxu0 %v2105_v28 }
  0x1e   : > { %2024 = vmatpush3.bf16.msra.mxu0 %v2105_v28 }
  0x1f   : > { %1978 = vmatpush3.bf16.msra.mxu1 %v2098_v17  ;;  %2025 = vmatprep.subr.bf16.mxu0 %v2106_v29 }
  0x20   : > { %1948 = vmatmul.mubr.msk.bf16.gmra.mxu0 %vm403_vm1, %v2084_v13  ;;  %1979 = vmatprep.subr.bf16.mxu1 %v2099_v18 }
  0x21   : > { %1951 = vmatprep.mubr.msk.bf16.mxu0 %vm403_vm1, %v2085_v14 }
  0x22   : > { %1964 = vmatmul.mubr.msk.bf16.gmra.mxu1 %vm403_vm1, %v2092_v20  ;;  %2026 = vmatpush3.bf16.msra.mxu0 %v2106_v29 }
  0x23   : > { %1967 = vmatprep.mubr.msk.bf16.mxu1 %vm403_vm1, %v2093_v21  ;;  %1980 = vmatpush3.bf16.msra.mxu1 %v2099_v18 }
  0x24   : > { %1981 = vmatprep.subr.bf16.mxu1 %v2100_v23  ;;  %2027 = vmatprep.subr.bf16.mxu0 %v2107_v30 }
  0x26   : > { %2028 = vmatpush3.bf16.msra.mxu0 %v2107_v30 }
  0x27   : > { %1982 = vmatpush3.bf16.msra.mxu1 %v2100_v23 }
  0x28   : > { %1952 = vmatmul.mubr.msk.bf16.gmra.mxu0 %vm403_vm1, %v2086_v19  ;;  %1983 = vmatprep.subr.bf16.mxu1 %v2101_v24 }
  0x2a   : > { %1968 = vmatmul.mubr.msk.bf16.gmra.mxu1 %vm403_vm1, %v2094_v22 }
  0x2b   : > { %1984 = vmatpush3.bf16.msra.mxu1 %v2101_v24 }
  0x2c   : > { %1985 = vmatprep.subr.bf16.mxu1 %v2102_v25 }
  0x2f   : > { %1986 = vmatpush3.bf16.msra.mxu1 %v2102_v25 }
  0xd0   : > { %v1941_v31 = vpop.f32.mrf.mxu0 }
  0xd1   : > { %v499_v37 = vadd.f32 %v1941_v31, %v2382_v33 }
  0xd2   : > { %v490_v32 = vpop.f32.mrf.mxu0  ;;  %v2388_v42 = vpop.f32.mrf.mxu1 }
  0xd3   : > { %v491_v35 = vadd.f32 %v2382_v33, %v490_v32  ;;  %v619_v45 = vmax.f32 %v499_v37, 0.0 }
  0xd4   : > { %v1942_v34 = vpop.f32.mrf.mxu0  ;;  %v554_v47 = vpop.f32.mrf.mxu1 }
  0xd5   : > { %v502_v36 = vadd.f32 %v1942_v34, %v2382_v33  ;;  %v617_v43 = vmax.f32 %v491_v35, 0.0  ;;  %v555_v21 = vadd.f32 %v2382_v33, %v554_v47 }
  0xd6   : > { %v493_v38 = vpop.f32.mrf.mxu0  ;;  %v2390_v51 = vpop.f32.mrf.mxu1 }
  0xd7   : > { %v494_v39 = vadd.f32 %v2382_v33, %v493_v38  ;;  %v620_v40 = vmax.f32 %v502_v36, 0.0  ;;  %v633_v30 = vmax.f32 %v555_v21, 0.0  ;;  %v2437_v21 = vld [vmem:[%s2906_s4] ss:$0 sm:$0xff] }
  0xd8   : > { %v1945_v41 = vpop.f32.mrf.mxu0  ;;  %v557_v56 = vpop.f32.mrf.mxu1 }
  0xd9   : > { %v618_v44 = vmax.f32 %v494_v39, 0.0  ;;  %v650_v49 = vpack.c.bf16 %v620_v40, %v619_v45  ;;  %v515_v54 = vadd.f32 %v1945_v41, %v2382_v33  ;;  %v558_v22 = vadd.f32 %v2382_v33, %v557_v56 }
  0xda   : > { %v506_v46 = vpop.f32.mrf.mxu0  ;;  %v2396_v60 = vpop.f32.mrf.mxu1 }
  0xdb   : > { %v649_v48 = vpack.c.bf16 %v618_v44, %v617_v43  ;;  %v507_v52 = vadd.f32 %v2382_v33, %v506_v46  ;;  %v623_v63 = vmax.f32 %v515_v54, 0.0  ;;  %v634_v32 = vmax.f32 %v558_v22, 0.0 }
  0xdc   : > { %v1946_v50 = vpop.f32.mrf.mxu0  ;;  %v570_v1 = vpop.f32.mrf.mxu1  ;;  %v563_v44 = vadd.f32 %v2388_v42, %v2382_v33  ;;  %v566_v46 = vadd.f32 %v2390_v51, %v2382_v33  ;;  %v579_v42 = vadd.f32 %v2396_v60, %v2382_v33 }
  0xdd   : > { %v518_v53 = vadd.f32 %v1946_v50, %v2382_v33  ;;  %1987 = vmatprep.mubr.bf16.mxu1 %v649_v48  ;;  %v621_v61 = vmax.f32 %v507_v52, 0.0  ;;  %v657_v40 = vpack.c.bf16 %v634_v32, %v633_v30  ;;  %v571_v41 = vadd.f32 %v2382_v33, %v570_v1 }
  0xde   : > { %v509_v55 = vpop.f32.mrf.mxu0  ;;  %1988 = vmatmul.mubr.bf16.vlgmr.msra.gmra.mxu1 %v650_v49  ;;  %v1962_v5 = vpop.f32.mrf.mxu1  ;;  %v635_v50 = vmax.f32 %v563_v44, 0.0  ;;  %v636_v52 = vmax.f32 %v566_v46, 0.0 }
  0xdf   : > { %v510_v57 = vadd.f32 %v2382_v33, %v509_v55  ;;  %v624_v58 = vmax.f32 %v518_v53, 0.0  ;;  %v637_v48 = vmax.f32 %v571_v41, 0.0  ;;  %v582_v51 = vadd.f32 %v1962_v5, %v2382_v33 }
  0xe0   : > { %v1949_v59 = vpop.f32.mrf.mxu0  ;;  %v573_v10 = vpop.f32.mrf.mxu1 }
  0xe1   : > { %v622_v62 = vmax.f32 %v510_v57, 0.0  ;;  %v652_v3 = vpack.c.bf16 %v624_v58, %v623_v63  ;;  %v531_v8 = vadd.f32 %v1949_v59, %v2382_v33  ;;  %v574_v43 = vadd.f32 %v2382_v33, %v573_v10 }
  0xe2   : > { %v522_v0 = vpop.f32.mrf.mxu0  ;;  %v1965_v14 = vpop.f32.mrf.mxu1  ;;  %v658_v57 = vpack.c.bf16 %v636_v52, %v635_v50  ;;  %v640_v63 = vmax.f32 %v582_v51, 0.0 }
  0xe3   : > { %v651_v2 = vpack.c.bf16 %v622_v62, %v621_v61  ;;  %v523_v6 = vadd.f32 %v2382_v33, %v522_v0  ;;  %v627_v17 = vmax.f32 %v531_v8, 0.0  ;;  %v638_v49 = vmax.f32 %v574_v43, 0.0 }
  0xe4   : > { %v1950_v4 = vpop.f32.mrf.mxu0  ;;  %v586_v19 = vpop.f32.mrf.mxu1  ;;  %v639_v62 = vmax.f32 %v579_v42, 0.0 }
  0xe5   : > { %v534_v7 = vadd.f32 %v1950_v4, %v2382_v33  ;;  %1991 = vmatprep.mubr.bf16.mxu1 %v651_v2  ;;  %v625_v15 = vmax.f32 %v523_v6, 0.0  ;;  %v659_v54 = vpack.c.bf16 %v638_v49, %v637_v48  ;;  %v587_v55 = vadd.f32 %v2382_v33, %v586_v19 }
  0xe6   : > { %v525_v9 = vpop.f32.mrf.mxu0  ;;  %1992 = vmatmul.mubr.bf16.gmra.mxu1 %v652_v3  ;;  %v1966_v25 = vpop.f32.mrf.mxu1  ;;  %v660_v4 = vpack.c.bf16 %v640_v63, %v639_v62  ;;  %v595_v6 = vadd.f32 %v1965_v14, %v2382_v33  ;;  %v2108_v14 = vld [vmem:[%s2907_s5 + $0x10] sm:$0xff]  }
  0xe7   : > { %v526_v11 = vadd.f32 %v2382_v33, %v525_v9  ;;  %v628_v12 = vmax.f32 %v534_v7, 0.0  ;;  %v641_v59 = vmax.f32 %v587_v55, 0.0  ;;  %v598_v60 = vadd.f32 %v1966_v25, %v2382_v33  ;;  %2029 = vmatprep.subr.bf16.mxu0 %v2108_v14 }
  0xe8   : > { %v1953_v13 = vpop.f32.mrf.mxu0  ;;  %v589_v35 = vpop.f32.mrf.mxu1  ;;  %v643_v8 = vmax.f32 %v595_v6, 0.0  ;;  %2030 = vmatpush3.bf16.msra.mxu0 %v2108_v14 }
  0xe9   : > { %v626_v16 = vmax.f32 %v526_v11, 0.0  ;;  %v654_v23 = vpack.c.bf16 %v628_v12, %v627_v17  ;;  %v547_v28 = vadd.f32 %v1953_v13, %v2382_v33  ;;  %v590_v56 = vadd.f32 %v2382_v33, %v589_v35 }
  0xea   : > { %v538_v18 = vpop.f32.mrf.mxu0  ;;  %v1969_v47 = vpop.f32.mrf.mxu1  ;;  %v644_v9 = vmax.f32 %v598_v60, 0.0 }
  0xeb   : > { %v653_v20 = vpack.c.bf16 %v626_v16, %v625_v15  ;;  %v539_v26 = vadd.f32 %v2382_v33, %v538_v18  ;;  %v631_v38 = vmax.f32 %v547_v28, 0.0  ;;  %v642_v61 = vmax.f32 %v590_v56, 0.0  ;;  %v2109_v18 = vld [vmem:[%s2907_s5 + $0x8] sm:$0xff]  }
  0xec   : > { %v1954_v24 = vpop.f32.mrf.mxu0  ;;  %v602_v53 = vpop.f32.mrf.mxu1  ;;  %v662_v11 = vpack.c.bf16 %v644_v9, %v643_v8  ;;  %v611_v12 = vadd.f32 %v1969_v47, %v2382_v33  ;;  %2031 = vmatprep.subr.bf16.mxu0 %v2109_v18 }
  0xed   : > { %v550_v27 = vadd.f32 %v1954_v24, %v2382_v33  ;;  %1995 = vmatprep.mubr.bf16.mxu1 %v653_v20  ;;  %v629_v36 = vmax.f32 %v539_v26, 0.0  ;;  %v661_v1 = vpack.c.bf16 %v642_v61, %v641_v59  ;;  %v603_v2 = vadd.f32 %v2382_v33, %v602_v53  ;;  %2032 = vmatpush3.bf16.msra.mxu0 %v2109_v18 }
  0xee   : > { %v541_v29 = vpop.f32.mrf.mxu0  ;;  %1996 = vmatmul.mubr.bf16.gmra.mxu1 %v654_v23  ;;  %v1970_v58 = vpop.f32.mrf.mxu1  ;;  %v647_v15 = vmax.f32 %v611_v12, 0.0 }
  0xef   : > { %v542_v31 = vadd.f32 %v2382_v33, %v541_v29  ;;  %v632_v34 = vmax.f32 %v550_v27, 0.0  ;;  %v645_v5 = vmax.f32 %v603_v2, 0.0  ;;  %v614_v13 = vadd.f32 %v1970_v58, %v2382_v33 }
  0xf0   : > { %v605_v0 = vpop.f32.mrf.mxu1 }
  0xf1   : > { %v630_v37 = vmax.f32 %v542_v31, 0.0  ;;  %v656_v45 = vpack.c.bf16 %v632_v34, %v631_v38  ;;  %v606_v3 = vadd.f32 %v2382_v33, %v605_v0  ;;  %v648_v16 = vmax.f32 %v614_v13, 0.0  ;;  %v2110_v33 = vld [vmem:[%s2907_s5] sm:$0xff]  }
  0xf2   : > { %2033 = vmatprep.subr.bf16.mxu0 %v2110_v33 }
  0xf3   : > { %v655_v39 = vpack.c.bf16 %v630_v37, %v629_v36  ;;  %v646_v7 = vmax.f32 %v606_v3, 0.0  ;;  %v664_v17 = vpack.c.bf16 %v648_v16, %v647_v15  ;;  %2034 = vmatpush3.bf16.msra.mxu0 %v2110_v33 }
  0xf5   : > { %1999 = vmatprep.mubr.bf16.mxu1 %v655_v39  ;;  %v663_v10 = vpack.c.bf16 %v646_v7, %v645_v5 }
  0xf6   : > { %2000 = vmatmul.mubr.bf16.gmra.mxu1 %v656_v45 }
  0xf7   : > { %2003 = vmatprep.mubr.bf16.mxu1 %v657_v40 }
  0xfe   : > { %2004 = vmatmul.mubr.bf16.gmra.mxu1 %v658_v57 }
  0xff   : > { %2007 = vmatprep.mubr.bf16.mxu1 %v659_v54 }
 0x106   : > { %2008 = vmatmul.mubr.bf16.gmra.mxu1 %v660_v4 }
 0x107   : > { %2011 = vmatprep.mubr.bf16.mxu1 %v661_v1 }
 0x10e   : > { %2012 = vmatmul.mubr.bf16.gmra.mxu1 %v662_v11 }
 0x10f   : > { %2015 = vmatprep.mubr.bf16.mxu1 %v663_v10 }
 0x116   : > { %2016 = vmatmul.mubr.bf16.gmra.mxu1 %v664_v17 }
 0x19e   : > { %v1989_v19 = vpop.f32.mrf.mxu1 }
 0x19f   : > { %v779_v25 = vadd.f32 %v1989_v19, %v2437_v21 }
 0x1a0   : > { %v770_v20 = vpop.f32.mrf.mxu1 }
 0x1a1   : > { %v771_v23 = vadd.f32 %v2437_v21, %v770_v20  ;;  %v899_v32 = vmax.f32 %v779_v25, 0.0 }
 0x1a2   : > { %v1990_v22 = vpop.f32.mrf.mxu1 }
 0x1a3   : > { %v782_v24 = vadd.f32 %v1990_v22, %v2437_v21  ;;  %v897_v30 = vmax.f32 %v771_v23, 0.0 }
 0x1a4   : > { %v773_v26 = vpop.f32.mrf.mxu1 }
 0x1a5   : > { %v774_v27 = vadd.f32 %v2437_v21, %v773_v26  ;;  %v900_v28 = vmax.f32 %v782_v24, 0.0 }
 0x1a6   : > { %v1993_v29 = vpop.f32.mrf.mxu1 }
 0x1a7   : > { %v898_v31 = vmax.f32 %v774_v27, 0.0  ;;  %v930_v36 = vpack.c.bf16 %v900_v28, %v899_v32  ;;  %v795_v40 = vadd.f32 %v1993_v29, %v2437_v21 }
 0x1a8   : > { %v786_v34 = vpop.f32.mrf.mxu1 }
 0x1a9   : > { %v929_v35 = vpack.c.bf16 %v898_v31, %v897_v30  ;;  %v787_v38 = vadd.f32 %v2437_v21, %v786_v34  ;;  %v903_v48 = vmax.f32 %v795_v40, 0.0 }
 0x1aa   : > { %v1994_v37 = vpop.f32.mrf.mxu1 }
 0x1ab   : > { %v798_v39 = vadd.f32 %v1994_v37, %v2437_v21  ;;  %2035 = vmatprep.mubr.bf16.mxu0 %v929_v35  ;;  %v901_v46 = vmax.f32 %v787_v38, 0.0 }
 0x1ac   : > { %v789_v41 = vpop.f32.mrf.mxu1  ;;  %2036 = vmatmul.mubr.bf16.vlgmr.msra.gmra.mxu0 %v930_v36 }
 0x1ad   : > { %v790_v43 = vadd.f32 %v2437_v21, %v789_v41  ;;  %v904_v44 = vmax.f32 %v798_v39, 0.0 }
 0x1ae   : > { %v1997_v45 = vpop.f32.mrf.mxu1 }
 0x1af   : > { %v902_v47 = vmax.f32 %v790_v43, 0.0  ;;  %v932_v52 = vpack.c.bf16 %v904_v44, %v903_v48  ;;  %v811_v56 = vadd.f32 %v1997_v45, %v2437_v21 }
 0x1b0   : > { %v802_v49 = vpop.f32.mrf.mxu1 }
 0x1b1   : > { %v931_v50 = vpack.c.bf16 %v902_v47, %v901_v46  ;;  %v803_v54 = vadd.f32 %v2437_v21, %v802_v49  ;;  %v907_v62 = vmax.f32 %v811_v56, 0.0 }
 0x1b2   : > { %v1998_v53 = vpop.f32.mrf.mxu1 }
 0x1b3   : > { %v814_v55 = vadd.f32 %v1998_v53, %v2437_v21  ;;  %2039 = vmatprep.mubr.bf16.mxu0 %v931_v50  ;;  %v905_v59 = vmax.f32 %v803_v54, 0.0 }
 0x1b4   : > { %v805_v57 = vpop.f32.mrf.mxu1  ;;  %2040 = vmatmul.mubr.bf16.gmra.mxu0 %v932_v52 }
 0x1b5   : > { %v806_v42 = vadd.f32 %v2437_v21, %v805_v57  ;;  %v908_v51 = vmax.f32 %v814_v55, 0.0 }
 0x1b6   : > { %v2001_v58 = vpop.f32.mrf.mxu1 }
 0x1b7   : > { %v906_v61 = vmax.f32 %v806_v42, 0.0  ;;  %v934_v1 = vpack.c.bf16 %v908_v51, %v907_v62  ;;  %v827_v6 = vadd.f32 %v2001_v58, %v2437_v21 }
 0x1b8   : > { %v818_v63 = vpop.f32.mrf.mxu1 }
 0x1b9   : > { %v933_v0 = vpack.c.bf16 %v906_v61, %v905_v59  ;;  %v819_v3 = vadd.f32 %v2437_v21, %v818_v63  ;;  %v911_v11 = vmax.f32 %v827_v6, 0.0 }
 0x1ba   : > { %v2002_v2 = vpop.f32.mrf.mxu1 }
 0x1bb   : > { %v830_v4 = vadd.f32 %v2002_v2, %v2437_v21  ;;  %2043 = vmatprep.mubr.bf16.mxu0 %v933_v0  ;;  %v909_v9 = vmax.f32 %v819_v3, 0.0 }
 0x1bc   : > { %v821_v60 = vpop.f32.mrf.mxu1  ;;  %2044 = vmatmul.mubr.bf16.gmra.mxu0 %v934_v1 }
 0x1bd   : > { %v822_v5 = vadd.f32 %v2437_v21, %v821_v60  ;;  %v912_v7 = vmax.f32 %v830_v4, 0.0 }
 0x1be   : > { %v2005_v8 = vpop.f32.mrf.mxu1 }
 0x1bf   : > { %v910_v10 = vmax.f32 %v822_v5, 0.0  ;;  %v936_v15 = vpack.c.bf16 %v912_v7, %v911_v11  ;;  %v843_v18 = vadd.f32 %v2005_v8, %v2437_v21  ;;  %v2474_v5 = vld [vmem:[%s2908_s6] ss:$0 sm:$0xff] }
 0x1c0   : > { %v834_v12 = vpop.f32.mrf.mxu1 }
 0x1c1   : > { %v935_v13 = vpack.c.bf16 %v910_v10, %v909_v9  ;;  %v835_v17 = vadd.f32 %v2437_v21, %v834_v12  ;;  %v915_v25 = vmax.f32 %v843_v18, 0.0 }
 0x1c2   : > { %v2006_v16 = vpop.f32.mrf.mxu1 }
 0x1c3   : > { %v846_v14 = vadd.f32 %v2006_v16, %v2437_v21  ;;  %2047 = vmatprep.mubr.bf16.mxu0 %v935_v13  ;;  %v913_v23 = vmax.f32 %v835_v17, 0.0 }
 0x1c4   : > { %v837_v33 = vpop.f32.mrf.mxu1  ;;  %2048 = vmatmul.mubr.bf16.gmra.mxu0 %v936_v15 }
 0x1c5   : > { %v838_v19 = vadd.f32 %v2437_v21, %v837_v33  ;;  %v916_v20 = vmax.f32 %v846_v14, 0.0 }
 0x1c6   : > { %v2009_v22 = vpop.f32.mrf.mxu1 }
 0x1c7   : > { %v914_v24 = vmax.f32 %v838_v19, 0.0  ;;  %v938_v28 = vpack.c.bf16 %v916_v20, %v915_v25  ;;  %v859_v32 = vadd.f32 %v2009_v22, %v2437_v21 }
 0x1c8   : > { %v850_v26 = vpop.f32.mrf.mxu1 }
 0x1c9   : > { %v937_v27 = vpack.c.bf16 %v914_v24, %v913_v23  ;;  %v851_v30 = vadd.f32 %v2437_v21, %v850_v26  ;;  %v919_v40 = vmax.f32 %v859_v32, 0.0 }
 0x1ca   : > { %v2010_v29 = vpop.f32.mrf.mxu1 }
 0x1cb   : > { %v862_v31 = vadd.f32 %v2010_v29, %v2437_v21  ;;  %2051 = vmatprep.mubr.bf16.mxu0 %v937_v27  ;;  %v917_v38 = vmax.f32 %v851_v30, 0.0 }
 0x1cc   : > { %v853_v34 = vpop.f32.mrf.mxu1  ;;  %2052 = vmatmul.mubr.bf16.gmra.mxu0 %v938_v28 }
 0x1cd   : > { %v854_v35 = vadd.f32 %v2437_v21, %v853_v34  ;;  %v920_v36 = vmax.f32 %v862_v31, 0.0 }
 0x1ce   : > { %v2013_v37 = vpop.f32.mrf.mxu1 }
 0x1cf   : > { %v918_v39 = vmax.f32 %v854_v35, 0.0  ;;  %v940_v44 = vpack.c.bf16 %v920_v36, %v919_v40  ;;  %v875_v48 = vadd.f32 %v2013_v37, %v2437_v21 }
 0x1d0   : > { %v866_v41 = vpop.f32.mrf.mxu1 }
 0x1d1   : > { %v939_v43 = vpack.c.bf16 %v918_v39, %v917_v38  ;;  %v867_v46 = vadd.f32 %v2437_v21, %v866_v41  ;;  %v923_v56 = vmax.f32 %v875_v48, 0.0 }
 0x1d2   : > { %v2014_v45 = vpop.f32.mrf.mxu1 }
 0x1d3   : > { %v878_v47 = vadd.f32 %v2014_v45, %v2437_v21  ;;  %2055 = vmatprep.mubr.bf16.mxu0 %v939_v43  ;;  %v921_v54 = vmax.f32 %v867_v46, 0.0 }
 0x1d4   : > { %v869_v49 = vpop.f32.mrf.mxu1  ;;  %2056 = vmatmul.mubr.bf16.gmra.mxu0 %v940_v44 }
 0x1d5   : > { %v870_v50 = vadd.f32 %v2437_v21, %v869_v49  ;;  %v924_v52 = vmax.f32 %v878_v47, 0.0 }
 0x1d6   : > { %v2017_v53 = vpop.f32.mrf.mxu1 }
 0x1d7   : > { %v922_v55 = vmax.f32 %v870_v50, 0.0  ;;  %v942_v51 = vpack.c.bf16 %v924_v52, %v923_v56  ;;  %v891_v62 = vadd.f32 %v2017_v53, %v2437_v21 }
 0x1d8   : > { %v882_v57 = vpop.f32.mrf.mxu1 }
 0x1d9   : > { %v941_v42 = vpack.c.bf16 %v922_v55, %v921_v54  ;;  %v883_v59 = vadd.f32 %v2437_v21, %v882_v57  ;;  %v927_v4 = vmax.f32 %v891_v62, 0.0 }
 0x1da   : > { %v2018_v58 = vpop.f32.mrf.mxu1 }
 0x1db   : > { %v894_v61 = vadd.f32 %v2018_v58, %v2437_v21  ;;  %2059 = vmatprep.mubr.bf16.mxu0 %v941_v42  ;;  %v925_v2 = vmax.f32 %v883_v59, 0.0 }
 0x1dc   : > { %v885_v63 = vpop.f32.mrf.mxu1  ;;  %2060 = vmatmul.mubr.bf16.gmra.mxu0 %v942_v51 }
 0x1dd   : > { %v886_v0 = vadd.f32 %v2437_v21, %v885_v63  ;;  %v928_v1 = vmax.f32 %v894_v61, 0.0 }
 0x1df   : > { %v926_v3 = vmax.f32 %v886_v0, 0.0  ;;  %v944_v60 = vpack.c.bf16 %v928_v1, %v927_v4 }
 0x1e1   : > { %v943_v6 = vpack.c.bf16 %v926_v3, %v925_v2 }
 0x1e3   : > { %2063 = vmatprep.mubr.bf16.mxu0 %v943_v6 }
 0x1e4   : > { %2064 = vmatmul.mubr.bf16.gmra.mxu0 %v944_v60 }
 0x26c   : > { %v2037_v7 = vpop.f32.mrf.mxu0 }
 0x26d   : > { %v2477_v8 = vadd.f32 %v2037_v7, %v2474_v5 }
 0x26e   : > { %v1050_v9 = vpop.f32.mrf.mxu0 }
 0x26f   : > { %v2480_v21 = vadd.f32 %v2474_v5, %v1050_v9  ;;  %v1183_v10 = vsel %vm403_vm1, %v2477_v8, -inf }
 0x270   : > { %1184 = vmax.xlane.f32.xlu1 %v1183_v10  ;;  %v2038_v11 = vpop.f32.mrf.mxu0 }
 0x271   : > { %v2485_v12 = vadd.f32 %v2038_v11, %v2474_v5  ;;  %v1177_v13 = vsel %vm403_vm1, %v2480_v21, -inf }
 0x272   : > { %v1053_v15 = vpop.f32.mrf.mxu0  ;;  %1178 = vmax.xlane.f32.xlu0 %v1177_v13 }
 0x273   : > { %v2490_v16 = vadd.f32 %v2474_v5, %v1053_v15  ;;  %v1186_v17 = vsel %vm403_vm1, %v2485_v12, -inf }
 0x274   : > { %1187 = vmax.xlane.f32.xlu1 %v1186_v17  ;;  %v2041_v14 = vpop.f32.mrf.mxu0 }
 0x275   : > { %v2495_v18 = vadd.f32 %v2041_v14, %v2474_v5  ;;  %v1180_v33 = vsel %vm403_vm1, %v2490_v16, -inf }
 0x276   : > { %v1066_v19 = vpop.f32.mrf.mxu0  ;;  %1181 = vmax.xlane.f32.xlu0 %v1180_v33 }
 0x277   : > { %v2500_v22 = vadd.f32 %v2474_v5, %v1066_v19  ;;  %v1195_v24 = vsel %vm403_vm1, %v2495_v18, -inf }
 0x278   : > { %v2042_v20 = vpop.f32.mrf.mxu0 }
 0x279   : > { %v2503_v23 = vadd.f32 %v2042_v20, %v2474_v5  ;;  %v1189_v30 = vsel %vm403_vm1, %v2500_v22, -inf }
 0x27a   : > { %v1069_v25 = vpop.f32.mrf.mxu0  ;;  %1196 = vmax.xlane.f32.xlu0 %v1195_v24 }
 0x27b   : > { %v2508_v26 = vadd.f32 %v2474_v5, %v1069_v25  ;;  %v1198_v27 = vsel %vm403_vm1, %v2503_v23, -inf }
 0x27c   : > { %1199 = vmax.xlane.f32.xlu1 %v1198_v27  ;;  %v2045_v28 = vpop.f32.mrf.mxu0 }
 0x27d   : > { %v2513_v29 = vadd.f32 %v2045_v28, %v2474_v5  ;;  %v1192_v32 = vsel %vm403_vm1, %v2508_v26, -inf }
 0x27e   : > { %v1082_v31 = vpop.f32.mrf.mxu0  ;;  %1190 = vmax.xlane.f32.xlu0 %v1189_v30 }
 0x27f   : > { %v2520_v35 = vadd.f32 %v2474_v5, %v1082_v31  ;;  %v1207_v37 = vsel %vm403_vm1, %v2513_v29, -inf }
 0x280   : > { %v2046_v34 = vpop.f32.mrf.mxu0  ;;  %1193 = vmax.xlane.f32.xlu1 %v1192_v32 }
 0x281   : > { %v2523_v36 = vadd.f32 %v2046_v34, %v2474_v5  ;;  %v1201_v44 = vsel %vm403_vm1, %v2520_v35, -inf }
 0x282   : > { %v1085_v38 = vpop.f32.mrf.mxu0  ;;  %1208 = vmax.xlane.f32.xlu0 %v1207_v37 }
 0x283   : > { %v2528_v39 = vadd.f32 %v2474_v5, %v1085_v38  ;;  %v1210_v40 = vsel %vm403_vm1, %v2523_v36, -inf }
 0x284   : > { %v2049_v41 = vpop.f32.mrf.mxu0  ;;  %1211 = vmax.xlane.f32.xlu1 %v1210_v40 }
 0x285   : > { %v2533_v43 = vadd.f32 %v2049_v41, %v2474_v5  ;;  %v1204_v46 = vsel %vm403_vm1, %v2528_v39, -inf }
 0x286   : > { %v1098_v45 = vpop.f32.mrf.mxu0  ;;  %1202 = vmax.xlane.f32.xlu0 %v1201_v44 }
 0x287   : > { %v2540_v48 = vadd.f32 %v2474_v5, %v1098_v45  ;;  %v1219_v50 = vsel %vm403_vm1, %v2533_v43, -inf }
 0x288   : > { %v2050_v47 = vpop.f32.mrf.mxu0  ;;  %1205 = vmax.xlane.f32.xlu1 %v1204_v46 }
 0x289   : > { %v2543_v49 = vadd.f32 %v2050_v47, %v2474_v5  ;;  %v1213_v57 = vsel %vm403_vm1, %v2540_v48, -inf }
 0x28a   : > { %v1101_v52 = vpop.f32.mrf.mxu0  ;;  %1220 = vmax.xlane.f32.xlu0 %v1219_v50 }
 0x28b   : > { %v2548_v53 = vadd.f32 %v2474_v5, %v1101_v52  ;;  %v1222_v54 = vsel %vm403_vm1, %v2543_v49, -inf }
 0x28c   : > { %v2053_v55 = vpop.f32.mrf.mxu0  ;;  %1223 = vmax.xlane.f32.xlu1 %v1222_v54 }
 0x28d   : > { %v2553_v56 = vadd.f32 %v2053_v55, %v2474_v5  ;;  %v1216_v51 = vsel %vm403_vm1, %v2548_v53, -inf }
 0x28e   : > { %v1114_v42 = vpop.f32.mrf.mxu0  ;;  %1214 = vmax.xlane.f32.xlu0 %v1213_v57 }
 0x28f   : > { %v2560_v59 = vadd.f32 %v2474_v5, %v1114_v42  ;;  %v1231_v62 = vsel %vm403_vm1, %v2553_v56, -inf }
 0x290   : > { %v2054_v58 = vpop.f32.mrf.mxu0  ;;  %1217 = vmax.xlane.f32.xlu1 %v1216_v51 }
 0x291   : > { %v2563_v61 = vadd.f32 %v2054_v58, %v2474_v5  ;;  %v1225_v4 = vsel %vm403_vm1, %v2560_v59, -inf }
 0x292   : > { %v1117_v63 = vpop.f32.mrf.mxu0  ;;  %1232 = vmax.xlane.f32.xlu0 %v1231_v62 }
 0x293   : > { %v2568_v0 = vadd.f32 %v2474_v5, %v1117_v63  ;;  %v1234_v1 = vsel %vm403_vm1, %v2563_v61, -inf }
 0x294   : > { %v2057_v2 = vpop.f32.mrf.mxu0  ;;  %1235 = vmax.xlane.f32.xlu1 %v1234_v1 }
 0x295   : > { %v2573_v3 = vadd.f32 %v2057_v2, %v2474_v5  ;;  %v1228_v60 = vsel %vm403_vm1, %v2568_v0, -inf }
 0x296   : > { %v1130_v6 = vpop.f32.mrf.mxu0  ;;  %1226 = vmax.xlane.f32.xlu0 %v1225_v4 }
 0x297   : > { %v2580_v9 = vadd.f32 %v2474_v5, %v1130_v6  ;;  %v1243_v11 = vsel %vm403_vm1, %v2573_v3, -inf }
 0x298   : > { %v2058_v7 = vpop.f32.mrf.mxu0  ;;  %1229 = vmax.xlane.f32.xlu1 %v1228_v60 }
 0x299   : > { %v2583_v10 = vadd.f32 %v2058_v7, %v2474_v5  ;;  %v1237_v19 = vsel %vm403_vm1, %v2580_v9, -inf }
 0x29a   : > { %v1133_v13 = vpop.f32.mrf.mxu0  ;;  %1244 = vmax.xlane.f32.xlu0 %v1243_v11 }
 0x29b   : > { %v2588_v15 = vadd.f32 %v2474_v5, %v1133_v13  ;;  %v1246_v17 = vsel %vm403_vm1, %v2583_v10, -inf }
 0x29c   : > { %v2061_v14 = vpop.f32.mrf.mxu0  ;;  %1247 = vmax.xlane.f32.xlu1 %v1246_v17 }
 0x29d   : > { %v2593_v33 = vadd.f32 %v2061_v14, %v2474_v5  ;;  %v1240_v24 = vsel %vm403_vm1, %v2588_v15, -inf }
 0x29e   : > { %v1146_v20 = vpop.f32.mrf.mxu0  ;;  %1238 = vmax.xlane.f32.xlu0 %v1237_v19 }
 0x29f   : > { %v2600_v27 = vadd.f32 %v2474_v5, %v1146_v20  ;;  %v1255_v30 = vsel %vm403_vm1, %v2593_v33, -inf }
 0x2a0   : > { %v2062_v25 = vpop.f32.mrf.mxu0  ;;  %1241 = vmax.xlane.f32.xlu1 %v1240_v24 }
 0x2a1   : > { %v2603_v28 = vadd.f32 %v2062_v25, %v2474_v5  ;;  %v1249_v38 = vsel %vm403_vm1, %v2600_v27, -inf }
 0x2a2   : > { %v1149_v31 = vpop.f32.mrf.mxu0  ;;  %1256 = vmax.xlane.f32.xlu0 %v1255_v30 }
 0x2a3   : > { %v2608_v32 = vadd.f32 %v2474_v5, %v1149_v31  ;;  %v1258_v34 = vsel %vm403_vm1, %v2603_v28, -inf }
 0x2a4   : > { %v2065_v37 = vpop.f32.mrf.mxu0  ;;  %1259 = vmax.xlane.f32.xlu1 %v1258_v34 }
 0x2a5   : > { %v1252_v44 = vsel %vm403_vm1, %v2608_v32, -inf  ;;  %v2620_v46 = vadd.f32 %v2065_v37, %v2474_v5 }
 0x2a6   : > { %v1162_v40 = vpop.f32.mrf.mxu0  ;;  %1250 = vmax.xlane.f32.xlu0 %v1249_v38 }
 0x2a7   : > { %v2615_v41 = vadd.f32 %v2474_v5, %v1162_v40  ;;  %v1267_v57 = vsel %vm403_vm1, %v2620_v46, -inf }
 0x2a8   : > { %v2066_v45 = vpop.f32.mrf.mxu0  ;;  %1253 = vmax.xlane.f32.xlu1 %v1252_v44 }
 0x2a9   : > { %v1261_v47 = vsel %vm403_vm1, %v2615_v41, -inf  ;;  %v2628_v54 = vadd.f32 %v2066_v45, %v2474_v5 }
 0x2aa   : > { %v1165_v50 = vpop.f32.mrf.mxu0  ;;  %1262 = vmax.xlane.f32.xlu0 %v1261_v47 }
 0x2ab   : > { %v2625_v52 = vadd.f32 %v2474_v5, %v1165_v50  ;;  %v1270_v42 = vsel %vm403_vm1, %v2628_v54, -inf }
 0x2ad   : > { %v1264_v55 = vsel %vm403_vm1, %v2625_v52, -inf }
 0x2ae   : > { %1265 = vmax.xlane.f32.xlu1 %v1264_v55  ;;  %1268 = vmax.xlane.f32.xlu0 %v1267_v57 }
 0x2b2   : > { %1271 = vmax.xlane.f32.xlu1 %v1270_v42 }
 0x2f9   : > { %v1185_v51 = vpop.xlane.xlu1 %1184 }
 0x2fa   : > { %v1275_v58 = vsub.f32 %v2477_v8, %v1185_v51 }
 0x2fb   : > { %v1179_v62 = vpop.xlane.xlu0 %1178 }
 0x2fc   : > { %v1309_v63 = vmul.f32 1.442695, %v1275_v58  ;;  %v1273_v5 = vsub.f32 %v2480_v21, %v1179_v62 }
 0x2fd   : > { %v1188_v1 = vpop.xlane.xlu1 %1187 }
 0x2fe   : > { %2111 = vpow2.f32 %v1309_v63  ;;  %v1305_v2 = vmul.f32 1.442695, %v1273_v5  ;;  %v1276_v4 = vsub.f32 %v2485_v12, %v1188_v1 }
 0x2ff   : > { %v1182_v6 = vpop.xlane.xlu0 %1181 }
 0x300   : > { %2113 = vpow2.f32 %v1305_v2  ;;  %v1311_v60 = vmul.f32 1.442695, %v1276_v4  ;;  %v1274_v7 = vsub.f32 %v2490_v16, %v1182_v6 }
 0x302   : > { %2115 = vpow2.f32 %v1311_v60  ;;  %v1307_v11 = vmul.f32 1.442695, %v1274_v7 }
 0x303   : > { %v1197_v13 = vpop.xlane.xlu0 %1196 }
 0x304   : > { %2117 = vpow2.f32 %v1307_v11  ;;  %v1279_v8 = vsub.f32 %v2495_v18, %v1197_v13 }
 0x305   : > { %v1200_v17 = vpop.xlane.xlu1 %1199 }
 0x306   : > { %v1317_v14 = vmul.f32 1.442695, %v1279_v8  ;;  %v1280_v21 = vsub.f32 %v2503_v23, %v1200_v17 }
 0x307   : > { %v1191_v19 = vpop.xlane.xlu0 %1190 }
 0x308   : > { %2119 = vpow2.f32 %v1317_v14  ;;  %v1319_v20 = vmul.f32 1.442695, %v1280_v21  ;;  %v1277_v12 = vsub.f32 %v2500_v22, %v1191_v19 }
 0x309   : > { %v1194_v24 = vpop.xlane.xlu1 %1193 }
 0x30a   : > { %2121 = vpow2.f32 %v1319_v20  ;;  %v1313_v25 = vmul.f32 1.442695, %v1277_v12  ;;  %v1278_v16 = vsub.f32 %v2508_v26, %v1194_v24 }
 0x30b   : > { %v2644_v30 = vpop.eup %2111  ;;  %v1209_v31 = vpop.xlane.xlu0 %1208 }
 0x30c   : > { %2123 = vpow2.f32 %v1313_v25  ;;  %v1315_v34 = vmul.f32 1.442695, %v1278_v16  ;;  %v1283_v18 = vsub.f32 %v2513_v29, %v1209_v31  ;;  %v1375_v23 = vsel %vm403_vm1, %v2644_v30, 0.0 }
 0x30d   : > { %v2649_v37 = vpop.eup %2113  ;;  %v1212_v38 = vpop.xlane.xlu1 %1211  ;;  %1376 = vadd.xlane.f32.xlu0 %v1375_v23 }
 0x30e   : > { %2125 = vpow2.f32 %v1315_v34  ;;  %v1325_v22 = vmul.f32 1.442695, %v1283_v18  ;;  %v1284_v40 = vsub.f32 %v2523_v36, %v1212_v38  ;;  %v1369_v45 = vsel %vm403_vm1, %v2649_v37, 0.0 }
 0x30f   : > { %v2652_v44 = vpop.eup %2115  ;;  %v1203_v26 = vpop.xlane.xlu0 %1202 }
 0x310   : > { %2127 = vpow2.f32 %v1325_v22  ;;  %v1327_v47 = vmul.f32 1.442695, %v1284_v40  ;;  %v1281_v29 = vsub.f32 %v2520_v35, %v1203_v26  ;;  %v1378_v50 = vsel %vm403_vm1, %v2652_v44, 0.0 }
 0x311   : > { %v2659_v55 = vpop.eup %2117  ;;  %1379 = vadd.xlane.f32.xlu1 %v1378_v50  ;;  %v1206_v57 = vpop.xlane.xlu1 %1205  ;;  %1370 = vadd.xlane.f32.xlu0 %v1369_v45 }
 0x312   : > { %2129 = vpow2.f32 %v1327_v47  ;;  %v1321_v36 = vmul.f32 1.442695, %v1281_v29  ;;  %v1282_v42 = vsub.f32 %v2528_v39, %v1206_v57  ;;  %v1372_v35 = vsel %vm403_vm1, %v2659_v55, 0.0 }
 0x313   : > { %v1221_v51 = vpop.xlane.xlu0 %1220 }
 0x314   : > { %2131 = vpow2.f32 %v1321_v36  ;;  %v1323_v58 = vmul.f32 1.442695, %v1282_v42  ;;  %v1287_v62 = vsub.f32 %v2533_v43, %v1221_v51 }
 0x315   : > { %v2665_v63 = vpop.eup %2119  ;;  %v1224_v5 = vpop.xlane.xlu1 %1223  ;;  %1373 = vadd.xlane.f32.xlu1 %v1372_v35 }
 0x316   : > { %2133 = vpow2.f32 %v1323_v58  ;;  %v1333_v1 = vmul.f32 1.442695, %v1287_v62  ;;  %v1288_v2 = vsub.f32 %v2543_v49, %v1224_v5  ;;  %v1387_v4 = vsel %vm403_vm1, %v2665_v63, 0.0 }
 0x317   : > { %v2670_v39 = vpop.eup %2121  ;;  %1388 = vadd.xlane.f32.xlu0 %v1387_v4  ;;  %v1215_v6 = vpop.xlane.xlu0 %1214 }
 0x318   : > { %2135 = vpow2.f32 %v1333_v1  ;;  %v1335_v43 = vmul.f32 1.442695, %v1288_v2  ;;  %v1285_v60 = vsub.f32 %v2540_v48, %v1215_v6  ;;  %v1390_v7 = vsel %vm403_vm1, %v2670_v39, 0.0 }
 0x319   : > { %v2675_v11 = vpop.eup %2123  ;;  %v1218_v13 = vpop.xlane.xlu1 %1217  ;;  %1391 = vadd.xlane.f32.xlu1 %v1390_v7 }
 0x31a   : > { %2137 = vpow2.f32 %v1335_v43  ;;  %v1329_v49 = vmul.f32 1.442695, %v1285_v60  ;;  %v1286_v8 = vsub.f32 %v2548_v53, %v1218_v13  ;;  %v1381_v17 = vsel %vm403_vm1, %v2675_v11, 0.0 }
 0x31b   : > { %v2680_v14 = vpop.eup %2125  ;;  %1382 = vadd.xlane.f32.xlu0 %v1381_v17  ;;  %v1233_v21 = vpop.xlane.xlu0 %1232 }
 0x31c   : > { %2139 = vpow2.f32 %v1329_v49  ;;  %v1331_v48 = vmul.f32 1.442695, %v1286_v8  ;;  %v1291_v19 = vsub.f32 %v2553_v56, %v1233_v21  ;;  %v1384_v20 = vsel %vm403_vm1, %v2680_v14, 0.0 }
 0x31d   : > { %v2685_v12 = vpop.eup %2127  ;;  %v1236_v24 = vpop.xlane.xlu1 %1235  ;;  %1385 = vadd.xlane.f32.xlu1 %v1384_v20 }
 0x31e   : > { %2141 = vpow2.f32 %v1331_v48  ;;  %v1341_v53 = vmul.f32 1.442695, %v1291_v19  ;;  %v1292_v25 = vsub.f32 %v2563_v61, %v1236_v24  ;;  %v1399_v16 = vsel %vm403_vm1, %v2685_v12, 0.0 }
 0x31f   : > { %v2690_v31 = vpop.eup %2129  ;;  %1400 = vadd.xlane.f32.xlu0 %v1399_v16  ;;  %v1227_v34 = vpop.xlane.xlu0 %1226 }
 0x320   : > { %2143 = vpow2.f32 %v1341_v53  ;;  %v1343_v56 = vmul.f32 1.442695, %v1292_v25  ;;  %v1289_v18 = vsub.f32 %v2560_v59, %v1227_v34  ;;  %v1402_v23 = vsel %vm403_vm1, %v2690_v31, 0.0 }
 0x321   : > { %v2695_v38 = vpop.eup %2131  ;;  %v1230_v22 = vpop.xlane.xlu1 %1229  ;;  %1403 = vadd.xlane.f32.xlu1 %v1402_v23 }
 0x322   : > { %2145 = vpow2.f32 %v1343_v56  ;;  %v1337_v61 = vmul.f32 1.442695, %v1289_v18  ;;  %v1290_v40 = vsub.f32 %v2568_v0, %v1230_v22  ;;  %v1393_v26 = vsel %vm403_vm1, %v2695_v38, 0.0 }
 0x323   : > { %v2700_v45 = vpop.eup %2133  ;;  %1394 = vadd.xlane.f32.xlu0 %v1393_v26  ;;  %v1245_v47 = vpop.xlane.xlu0 %1244 }
 0x324   : > { %2147 = vpow2.f32 %v1337_v61  ;;  %v1339_v59 = vmul.f32 1.442695, %v1290_v40  ;;  %v1295_v29 = vsub.f32 %v2573_v3, %v1245_v47  ;;  %v1396_v50 = vsel %vm403_vm1, %v2700_v45, 0.0 }
 0x325   : > { %v2705_v57 = vpop.eup %2135  ;;  %v1248_v36 = vpop.xlane.xlu1 %1247  ;;  %1397 = vadd.xlane.f32.xlu1 %v1396_v50 }
 0x326   : > { %2149 = vpow2.f32 %v1339_v59  ;;  %v1349_v0 = vmul.f32 1.442695, %v1295_v29  ;;  %v1296_v42 = vsub.f32 %v2583_v10, %v1248_v36  ;;  %v1411_v51 = vsel %vm403_vm1, %v2705_v57, 0.0 }
 0x327   : > { %v2710_v58 = vpop.eup %2137  ;;  %1412 = vadd.xlane.f32.xlu0 %v1411_v51  ;;  %v1239_v62 = vpop.xlane.xlu0 %1238 }
 0x328   : > { %2151 = vpow2.f32 %v1349_v0  ;;  %v1351_v3 = vmul.f32 1.442695, %v1296_v42  ;;  %v1293_v35 = vsub.f32 %v2580_v9, %v1239_v62  ;;  %v1414_v5 = vsel %vm403_vm1, %v2710_v58, 0.0 }
 0x329   : > { %v2715_v1 = vpop.eup %2139  ;;  %v1242_v2 = vpop.xlane.xlu1 %1241  ;;  %1415 = vadd.xlane.f32.xlu1 %v1414_v5 }
 0x32a   : > { %2153 = vpow2.f32 %v1351_v3  ;;  %v1345_v10 = vmul.f32 1.442695, %v1293_v35  ;;  %v1294_v4 = vsub.f32 %v2588_v15, %v1242_v2  ;;  %v1405_v6 = vsel %vm403_vm1, %v2715_v1, 0.0 }
 0x32b   : > { %v2720_v43 = vpop.eup %2141  ;;  %1406 = vadd.xlane.f32.xlu0 %v1405_v6  ;;  %v1257_v60 = vpop.xlane.xlu0 %1256 }
 0x32c   : > { %2155 = vpow2.f32 %v1345_v10  ;;  %v1347_v9 = vmul.f32 1.442695, %v1294_v4  ;;  %v1299_v7 = vsub.f32 %v2593_v33, %v1257_v60  ;;  %v1408_v13 = vsel %vm403_vm1, %v2720_v43, 0.0 }
 0x32d   : > { %v2725_v49 = vpop.eup %2143  ;;  %v1260_v8 = vpop.xlane.xlu1 %1259  ;;  %1409 = vadd.xlane.f32.xlu1 %v1408_v13 }
 0x32e   : > { %2157 = vpow2.f32 %v1347_v9  ;;  %v1357_v15 = vmul.f32 1.442695, %v1299_v7  ;;  %v1300_v17 = vsub.f32 %v2603_v28, %v1260_v8  ;;  %v1423_v21 = vsel %vm403_vm1, %v2725_v49, 0.0 }
 0x32f   : > { %v2730_v48 = vpop.eup %2145  ;;  %1424 = vadd.xlane.f32.xlu0 %v1423_v21  ;;  %v1251_v19 = vpop.xlane.xlu0 %1250 }
 0x330   : > { %2159 = vpow2.f32 %v1357_v15  ;;  %v1359_v33 = vmul.f32 1.442695, %v1300_v17  ;;  %v1297_v20 = vsub.f32 %v2600_v27, %v1251_v19  ;;  %v1426_v24 = vsel %vm403_vm1, %v2730_v48, 0.0 }
 0x331   : > { %v2735_v53 = vpop.eup %2147  ;;  %v1254_v25 = vpop.xlane.xlu1 %1253  ;;  %1427 = vadd.xlane.f32.xlu1 %v1426_v24 }
 0x332   : > { %2161 = vpow2.f32 %v1359_v33  ;;  %v1353_v28 = vmul.f32 1.442695, %v1297_v20  ;;  %v1298_v16 = vsub.f32 %v2608_v32, %v1254_v25  ;;  %v1417_v34 = vsel %vm403_vm1, %v2735_v53, 0.0 }
 0x333   : > { %v2740_v56 = vpop.eup %2149  ;;  %1418 = vadd.xlane.f32.xlu0 %v1417_v34  ;;  %v1263_v18 = vpop.xlane.xlu0 %1262 }
 0x334   : > { %2163 = vpow2.f32 %v1353_v28  ;;  %v1355_v27 = vmul.f32 1.442695, %v1298_v16  ;;  %v1301_v23 = vsub.f32 %v2615_v41, %v1263_v18  ;;  %v1420_v22 = vsel %vm403_vm1, %v2740_v56, 0.0 }
 0x335   : > { %v2745_v61 = vpop.eup %2151  ;;  %1421 = vadd.xlane.f32.xlu1 %v1420_v22 }
 0x336   : > { %2165 = vpow2.f32 %v1355_v27  ;;  %v1361_v40 = vmul.f32 1.442695, %v1301_v23  ;;  %v1435_v32 = vsel %vm403_vm1, %v2745_v61, 0.0 }
 0x337   : > { %v2749_v26 = vpop.eup %2153  ;;  %v1266_v47 = vpop.xlane.xlu1 %1265  ;;  %1436 = vadd.xlane.f32.xlu0 %v1435_v32 }
 0x338   : > { %v1269_v59 = vpop.xlane.xlu0 %1268  ;;  %2167 = vpow2.f32 %v1361_v40  ;;  %v1302_v29 = vsub.f32 %v2625_v52, %v1266_v47  ;;  %v1438_v50 = vsel %vm403_vm1, %v2749_v26, 0.0 }
 0x339   : > { %v1303_v41 = vsub.f32 %v2620_v46, %v1269_v59  ;;  %v2755_v36 = vpop.eup %2155  ;;  %1439 = vadd.xlane.f32.xlu1 %v1438_v50 }
 0x33a   : > { %v1363_v0 = vmul.f32 1.442695, %v1302_v29  ;;  %v1429_v51 = vsel %vm403_vm1, %v2755_v36, 0.0 }
 0x33b   : > { %v1365_v42 = vmul.f32 1.442695, %v1303_v41  ;;  %v2759_v62 = vpop.eup %2157  ;;  %v1272_v3 = vpop.xlane.xlu1 %1271  ;;  %1430 = vadd.xlane.f32.xlu0 %v1429_v51 }
 0x33c   : > { %2169 = vpow2.f32 %v1363_v0  ;;  %v1304_v52 = vsub.f32 %v2628_v54, %v1272_v3  ;;  %v1432_v46 = vsel %vm403_vm1, %v2759_v62, 0.0 }
 0x33d   : > { %v2764_v35 = vpop.eup %2159  ;;  %2171 = vpow2.f32 %v1365_v42  ;;  %1433 = vadd.xlane.f32.xlu1 %v1432_v46 }
 0x33e   : > { %v1367_v5 = vmul.f32 1.442695, %v1304_v52  ;;  %v1447_v2 = vsel %vm403_vm1, %v2764_v35, 0.0 }
 0x33f   : > { %v2768_v10 = vpop.eup %2161  ;;  %1448 = vadd.xlane.f32.xlu0 %v1447_v2 }
 0x340   : > { %2173 = vpow2.f32 %v1367_v5  ;;  %v1450_v4 = vsel %vm403_vm1, %v2768_v10, 0.0 }
 0x341   : > { %v2772_v6 = vpop.eup %2163  ;;  %1451 = vadd.xlane.f32.xlu1 %v1450_v4 }
 0x342   : > { %v1441_v54 = vsel %vm403_vm1, %v2772_v6, 0.0 }
 0x343   : > { %v2776_v60 = vpop.eup %2165  ;;  %1442 = vadd.xlane.f32.xlu0 %v1441_v54 }
 0x344   : > { %v1444_v9 = vsel %vm403_vm1, %v2776_v60, 0.0 }
 0x345   : > { %v2780_v7 = vpop.eup %2167  ;;  %1445 = vadd.xlane.f32.xlu1 %v1444_v9 }
 0x346   : > { %v1453_v13 = vsel %vm403_vm1, %v2780_v7, 0.0 }
 0x347   : > { %1454 = vadd.xlane.f32.xlu0 %v1453_v13 }
 0x349   : > { %v2784_v8 = vpop.eup %2169 }
 0x34a   : > { %v2786_v15 = vpop.eup %2171  ;;  %v1456_v17 = vsel %vm403_vm1, %v2784_v8, 0.0 }
 0x34b   : > { %1457 = vadd.xlane.f32.xlu1 %v1456_v17  ;;  %v1459_v21 = vsel %vm403_vm1, %v2786_v15, 0.0 }
 0x34c   : > { %1460 = vadd.xlane.f32.xlu0 %v1459_v21 }
 0x34d   : > { %v2792_v19 = vpop.eup %2173 }
 0x34e   : > { %v1462_v33 = vsel %vm403_vm1, %v2792_v19, 0.0 }
 0x34f   : > { %1463 = vadd.xlane.f32.xlu1 %v1462_v33 }
 0x396   : > { %v1377_v20 = vpop.xlane.xlu0 %1376 }
 0x397   : > { %2175 = vrcp.f32 %v1377_v20 }
 0x39a   : > { %v1380_v24 = vpop.xlane.xlu1 %1379  ;;  %v1371_v25 = vpop.xlane.xlu0 %1370 }
 0x39b   : > { %2177 = vrcp.f32 %v1380_v24 }
 0x39c   : > { %2179 = vrcp.f32 %v1371_v25 }
 0x39e   : > { %v1374_v28 = vpop.xlane.xlu1 %1373 }
 0x39f   : > { %2181 = vrcp.f32 %v1374_v28 }
 0x3a0   : > { %v1389_v16 = vpop.xlane.xlu0 %1388 }
 0x3a1   : > { %2183 = vrcp.f32 %v1389_v16 }
 0x3a2   : > { %v1392_v34 = vpop.xlane.xlu1 %1391 }
 0x3a3   : > { %2185 = vrcp.f32 %v1392_v34 }
 0x3a4   : > { %v2176_v18 = vpop.eup %2175  ;;  %v1383_v27 = vpop.xlane.xlu0 %1382 }
 0x3a5   : > { %v1499_v23 = vmul.f32 %v2176_v18, %v2644_v30  ;;  %2187 = vrcp.f32 %v1383_v27 }
 0x3a6   : > { %v1386_v22 = vpop.xlane.xlu1 %1385 }
 0x3a7   : > { %v1842_v40 = vpack.c.bf16 %v1499_v23, %v1499_v23  ;;  %2189 = vrcp.f32 %v1386_v22 }
 0x3a8   : > { %v2178_v32 = vpop.eup %2177  ;;  %v1401_v47 = vpop.xlane.xlu0 %1400 }
 0x3a9   : > { %v2180_v59 = vpop.eup %2179  ;;  %1660 = vst.msk [vmem:[%s2802_s10 + $0x8] sm:$0xf] %vm1657_vm2, %v1842_v40  ;;  %v1500_v30 = vmul.f32 %v2178_v32, %v2652_v44  ;;  %2191 = vrcp.f32 %v1401_v47 }
 0x3aa   : > { %v1497_v29 = vmul.f32 %v2180_v59, %v2649_v37  ;;  %v1404_v41 = vpop.xlane.xlu1 %1403 }
 0x3ab   : > { %v1843_v50 = vpack.c.bf16 %v1500_v30, %v1500_v30  ;;  %2193 = vrcp.f32 %v1404_v41 }
 0x3ac   : > { %v2182_v0 = vpop.eup %2181  ;;  %v1840_v42 = vpack.c.bf16 %v1497_v29, %v1497_v29  ;;  %v1395_v51 = vpop.xlane.xlu0 %1394 }
 0x3ad   : > { %1661 = vst.msk [vmem:[%s2802_s10 + $0xc] sm:$0xf] %vm1657_vm2, %v1843_v50  ;;  %v1498_v3 = vmul.f32 %v2182_v0, %v2659_v55  ;;  %2195 = vrcp.f32 %v1395_v51 }
 0x3ae   : > { %v2184_v52 = vpop.eup %2183  ;;  %1658 = vst.msk [vmem:[%s2802_s10] sm:$0xf] %vm1657_vm2, %v1840_v42  ;;  %v1398_v44 = vpop.xlane.xlu1 %1397 }
 0x3af   : > { %v1841_v46 = vpack.c.bf16 %v1498_v3, %v1498_v3  ;;  %v1503_v37 = vmul.f32 %v2184_v52, %v2665_v63  ;;  %2197 = vrcp.f32 %v1398_v44 }
 0x3b0   : > { %v2186_v5 = vpop.eup %2185  ;;  %v1413_v2 = vpop.xlane.xlu0 %1412 }
 0x3b1   : > { %1659 = vst.msk [vmem:[%s2802_s10 + $0x4] sm:$0xf] %vm1657_vm2, %v1841_v46  ;;  %v1846_v4 = vpack.c.bf16 %v1503_v37, %v1503_v37  ;;  %v1504_v54 = vmul.f32 %v2186_v5, %v2670_v39  ;;  %2199 = vrcp.f32 %v1413_v2 }
 0x3b2   : > { %v2188_v55 = vpop.eup %2187  ;;  %v1416_v9 = vpop.xlane.xlu1 %1415 }
 0x3b3   : > { %1664 = vst.msk [vmem:[%s2802_s10 + $0x18] sm:$0xf] %vm1657_vm2, %v1846_v4  ;;  %v1847_v13 = vpack.c.bf16 %v1504_v54, %v1504_v54  ;;  %v1501_v17 = vmul.f32 %v2188_v55, %v2675_v11  ;;  %2201 = vrcp.f32 %v1416_v9 }
 0x3b4   : > { %v2190_v63 = vpop.eup %2189  ;;  %v1407_v21 = vpop.xlane.xlu0 %1406 }
 0x3b5   : > { %1665 = vst.msk [vmem:[%s2802_s10 + $0x1c] sm:$0xf] %vm1657_vm2, %v1847_v13  ;;  %v1844_v33 = vpack.c.bf16 %v1501_v17, %v1501_v17  ;;  %v1502_v20 = vmul.f32 %v2190_v63, %v2680_v14  ;;  %2203 = vrcp.f32 %v1407_v21 }
 0x3b6   : > { %v2192_v39 = vpop.eup %2191  ;;  %v1410_v24 = vpop.xlane.xlu1 %1409 }
 0x3b7   : > { %1662 = vst.msk [vmem:[%s2802_s10 + $0x10] sm:$0xf] %vm1657_vm2, %v1844_v33  ;;  %v1845_v25 = vpack.c.bf16 %v1502_v20, %v1502_v20  ;;  %v1507_v28 = vmul.f32 %v2192_v39, %v2685_v12  ;;  %2205 = vrcp.f32 %v1410_v24 }
 0x3b8   : > { %v2194_v11 = vpop.eup %2193  ;;  %v1425_v16 = vpop.xlane.xlu0 %1424 }
 0x3b9   : > { %1663 = vst.msk [vmem:[%s2802_s10 + $0x14] sm:$0xf] %vm1657_vm2, %v1845_v25  ;;  %v1850_v34 = vpack.c.bf16 %v1507_v28, %v1507_v28  ;;  %v1508_v18 = vmul.f32 %v2194_v11, %v2690_v31  ;;  %2207 = vrcp.f32 %v1425_v16 }
 0x3ba   : > { %v2196_v14 = vpop.eup %2195  ;;  %v1428_v27 = vpop.xlane.xlu1 %1427 }
 0x3bb   : > { %1668 = vst.msk [vmem:[%s2802_s10 + $0x28] sm:$0xf] %vm1657_vm2, %v1850_v34  ;;  %v1851_v23 = vpack.c.bf16 %v1508_v18, %v1508_v18  ;;  %v1505_v22 = vmul.f32 %v2196_v14, %v2695_v38  ;;  %2209 = vrcp.f32 %v1428_v27 }
 0x3bc   : > { %v2198_v12 = vpop.eup %2197  ;;  %v1419_v40 = vpop.xlane.xlu0 %1418 }
 0x3bd   : > { %1669 = vst.msk [vmem:[%s2802_s10 + $0x2c] sm:$0xf] %vm1657_vm2, %v1851_v23  ;;  %v1848_v32 = vpack.c.bf16 %v1505_v22, %v1505_v22  ;;  %v1506_v47 = vmul.f32 %v2198_v12, %v2700_v45  ;;  %2211 = vrcp.f32 %v1419_v40 }
 0x3be   : > { %v2200_v31 = vpop.eup %2199  ;;  %v1422_v59 = vpop.xlane.xlu1 %1421 }
 0x3bf   : > { %1666 = vst.msk [vmem:[%s2802_s10 + $0x20] sm:$0xf] %vm1657_vm2, %v1848_v32  ;;  %v1849_v30 = vpack.c.bf16 %v1506_v47, %v1506_v47  ;;  %v1511_v29 = vmul.f32 %v2200_v31, %v2705_v57  ;;  %2213 = vrcp.f32 %v1422_v59 }
 0x3c0   : > { %v2202_v38 = vpop.eup %2201  ;;  %v1437_v41 = vpop.xlane.xlu0 %1436 }
 0x3c1   : > { %1667 = vst.msk [vmem:[%s2802_s10 + $0x24] sm:$0xf] %vm1657_vm2, %v1849_v30  ;;  %v1854_v50 = vpack.c.bf16 %v1511_v29, %v1511_v29  ;;  %v1512_v0 = vmul.f32 %v2202_v38, %v2710_v58  ;;  %2215 = vrcp.f32 %v1437_v41 }
 0x3c2   : > { %v2204_v45 = vpop.eup %2203  ;;  %v1440_v42 = vpop.xlane.xlu1 %1439 }
 0x3c3   : > { %1672 = vst.msk [vmem:[%s2802_s10 + $0x38] sm:$0xf] %vm1657_vm2, %v1854_v50  ;;  %v1855_v51 = vpack.c.bf16 %v1512_v0, %v1512_v0  ;;  %v1509_v3 = vmul.f32 %v2204_v45, %v2715_v1  ;;  %2217 = vrcp.f32 %v1440_v42 }
 0x3c4   : > { %v2206_v57 = vpop.eup %2205  ;;  %v1431_v52 = vpop.xlane.xlu0 %1430 }
 0x3c5   : > { %1673 = vst.msk [vmem:[%s2802_s10 + $0x3c] sm:$0xf] %vm1657_vm2, %v1855_v51  ;;  %v1852_v44 = vpack.c.bf16 %v1509_v3, %v1509_v3  ;;  %v1510_v46 = vmul.f32 %v2206_v57, %v2720_v43  ;;  %2219 = vrcp.f32 %v1431_v52 }
 0x3c6   : > { %v2208_v58 = vpop.eup %2207  ;;  %v1434_v37 = vpop.xlane.xlu1 %1433 }
 0x3c7   : > { %1670 = vst.msk [vmem:[%s2802_s10 + $0x30] sm:$0xf] %vm1657_vm2, %v1852_v44  ;;  %v1853_v5 = vpack.c.bf16 %v1510_v46, %v1510_v46  ;;  %v1515_v2 = vmul.f32 %v2208_v58, %v2725_v49  ;;  %2221 = vrcp.f32 %v1434_v37 }
 0x3c8   : > { %v2210_v1 = vpop.eup %2209  ;;  %v1449_v4 = vpop.xlane.xlu0 %1448 }
 0x3c9   : > { %1671 = vst.msk [vmem:[%s2802_s10 + $0x34] sm:$0xf] %vm1657_vm2, %v1853_v5  ;;  %v1858_v54 = vpack.c.bf16 %v1515_v2, %v1515_v2  ;;  %v1516_v55 = vmul.f32 %v2210_v1, %v2730_v48  ;;  %2223 = vrcp.f32 %v1449_v4 }
 0x3ca   : > { %v2212_v43 = vpop.eup %2211  ;;  %v1452_v9 = vpop.xlane.xlu1 %1451 }
 0x3cb   : > { %1676 = vst.msk [vmem:[%s2802_s10 + $0x48] sm:$0xf] %vm1657_vm2, %v1858_v54  ;;  %v1859_v13 = vpack.c.bf16 %v1516_v55, %v1516_v55  ;;  %v1513_v17 = vmul.f32 %v2212_v43, %v2735_v53  ;;  %2225 = vrcp.f32 %v1452_v9 }
 0x3cc   : > { %v2214_v49 = vpop.eup %2213  ;;  %v1443_v63 = vpop.xlane.xlu0 %1442 }
 0x3cd   : > { %1677 = vst.msk [vmem:[%s2802_s10 + $0x4c] sm:$0xf] %vm1657_vm2, %v1859_v13  ;;  %v1856_v21 = vpack.c.bf16 %v1513_v17, %v1513_v17  ;;  %v1514_v33 = vmul.f32 %v2214_v49, %v2740_v56  ;;  %2227 = vrcp.f32 %v1443_v63 }
 0x3ce   : > { %v2216_v48 = vpop.eup %2215  ;;  %v1446_v20 = vpop.xlane.xlu1 %1445 }
 0x3cf   : > { %1674 = vst.msk [vmem:[%s2802_s10 + $0x40] sm:$0xf] %vm1657_vm2, %v1856_v21  ;;  %v1857_v39 = vpack.c.bf16 %v1514_v33, %v1514_v33  ;;  %v1519_v24 = vmul.f32 %v2216_v48, %v2745_v61  ;;  %2229 = vrcp.f32 %v1446_v20 }
 0x3d0   : > { %v2218_v53 = vpop.eup %2217  ;;  %v1455_v25 = vpop.xlane.xlu0 %1454 }
 0x3d1   : > { %1675 = vst.msk [vmem:[%s2802_s10 + $0x44] sm:$0xf] %vm1657_vm2, %v1857_v39  ;;  %v1862_v28 = vpack.c.bf16 %v1519_v24, %v1519_v24  ;;  %v1520_v11 = vmul.f32 %v2218_v53, %v2749_v26  ;;  %2231 = vrcp.f32 %v1455_v25 }
 0x3d2   : > { %v2220_v56 = vpop.eup %2219 }
 0x3d3   : > { %1680 = vst.msk [vmem:[%s2802_s10 + $0x58] sm:$0xf] %vm1657_vm2, %v1862_v28  ;;  %v1863_v16 = vpack.c.bf16 %v1520_v11, %v1520_v11  ;;  %v1517_v34 = vmul.f32 %v2220_v56, %v2755_v36 }
 0x3d4   : > { %v2222_v18 = vpop.eup %2221  ;;  %v1458_v14 = vpop.xlane.xlu1 %1457 }
 0x3d5   : > { %1681 = vst.msk [vmem:[%s2802_s10 + $0x5c] sm:$0xf] %vm1657_vm2, %v1863_v16  ;;  %v1860_v61 = vpack.c.bf16 %v1517_v34, %v1517_v34  ;;  %v1518_v27 = vmul.f32 %v2222_v18, %v2759_v62  ;;  %2233 = vrcp.f32 %v1458_v14  ;;  %v1461_v23 = vpop.xlane.xlu0 %1460 }
 0x3d6   : > { %v2224_v22 = vpop.eup %2223  ;;  %2235 = vrcp.f32 %v1461_v23 }
 0x3d7   : > { %1678 = vst.msk [vmem:[%s2802_s10 + $0x50] sm:$0xf] %vm1657_vm2, %v1860_v61  ;;  %v1861_v26 = vpack.c.bf16 %v1518_v27, %v1518_v27  ;;  %v1523_v12 = vmul.f32 %v2224_v22, %v2764_v35 }
 0x3d8   : > { %v2226_v36 = vpop.eup %2225  ;;  %v1464_v40 = vpop.xlane.xlu1 %1463 }
 0x3d9   : > { %1679 = vst.msk [vmem:[%s2802_s10 + $0x54] sm:$0xf] %vm1657_vm2, %v1861_v26  ;;  %v1866_v32 = vpack.c.bf16 %v1523_v12, %v1523_v12  ;;  %v1524_v47 = vmul.f32 %v2226_v36, %v2768_v10  ;;  %2237 = vrcp.f32 %v1464_v40 }
 0x3da   : > { %v2228_v62 = vpop.eup %2227 }
 0x3db   : > { %1684 = vst.msk [vmem:[%s2802_s10 + $0x68] sm:$0xf] %vm1657_vm2, %v1866_v32  ;;  %v1867_v31 = vpack.c.bf16 %v1524_v47, %v1524_v47  ;;  %v1521_v59 = vmul.f32 %v2228_v62, %v2772_v6 }
 0x3dc   : > { %v2230_v30 = vpop.eup %2229 }
 0x3dd   : > { %1685 = vst.msk [vmem:[%s2802_s10 + $0x6c] sm:$0xf] %vm1657_vm2, %v1867_v31  ;;  %v1864_v35 = vpack.c.bf16 %v1521_v59, %v1521_v59  ;;  %v1522_v29 = vmul.f32 %v2230_v30, %v2776_v60 }
 0x3de   : > { %v2232_v38 = vpop.eup %2231 }
 0x3df   : > { %1682 = vst.msk [vmem:[%s2802_s10 + $0x60] sm:$0xf] %vm1657_vm2, %v1864_v35  ;;  %v1865_v10 = vpack.c.bf16 %v1522_v29, %v1522_v29  ;;  %v1525_v41 = vmul.f32 %v2232_v38, %v2780_v7 }
 0x3e1   : > { %1683 = vst.msk [vmem:[%s2802_s10 + $0x64] sm:$0xf] %vm1657_vm2, %v1865_v10  ;;  %v1868_v50 = vpack.c.bf16 %v1525_v41, %v1525_v41 }
 0x3e2   : > { %v2234_v0 = vpop.eup %2233 }
 0x3e3   : > { %v2236_v6 = vpop.eup %2235  ;;  %1686 = vst.msk [vmem:[%s2802_s10 + $0x70] sm:$0xf] %vm1657_vm2, %v1868_v50  ;;  %v1526_v45 = vmul.f32 %v2234_v0, %v2784_v8 }
 0x3e4   : > { %v1527_v42 = vmul.f32 %v2236_v6, %v2786_v15 }
 0x3e5   : > { %v1869_v60 = vpack.c.bf16 %v1526_v45, %v1526_v45 }
 0x3e6   : > { %v2238_v51 = vpop.eup %2237  ;;  %v1870_v3 = vpack.c.bf16 %v1527_v42, %v1527_v42 }
 0x3e7   : > { %1687 = vst.msk [vmem:[%s2802_s10 + $0x74] sm:$0xf] %vm1657_vm2, %v1869_v60  ;;  %v1528_v57 = vmul.f32 %v2238_v51, %v2792_v19 }
 0x3e8   : > { %1688 = vst.msk [vmem:[%s2802_s10 + $0x78] sm:$0xf] %vm1657_vm2, %v1870_v3 }
 0x3e9   : > { %v1871_v7 = vpack.c.bf16 %v1528_v57, %v1528_v57 }
 0x3eb   : > { %1689 = vst.msk [vmem:[%s2802_s10 + $0x7c] sm:$0xf] %vm1657_vm2, %v1871_v7 }
 0x3ec PF: > { %s17_s24 = sadd.s32 1, %s2245_s24  }
 0x3ed   : > { %p14_p4 = scmp.ge.s32.totalorder %s17_s24, 4  }
 0x3ef   :  { %16 = sbr.rel (!%p14_p4) target bundleno = 1 (0x1), region = 78 }

</bundles_post_ra>
